<compile_context>
chip_gen: v6e
topology: v6e:2x2x1
jax: 0.10.0
libtpu: 0.0.40
codegen_flags: <defaults>
</compile_context>

<pallas_src>
import jax
import jax.numpy as jnp
from jax.experimental import pallas as pl
from jax.experimental.pallas import tpu as pltpu

ALPHA = 3          # SimilarityLoss(alpha=3)
OUT_SCALE = 0.001  # CrossCorrelation(out_scale=0.001)
EPS = 1e-8         # nn.CosineSimilarity default eps


def _round_up(x, m):
    return (x + m - 1) // m * m


def _im2col_kq(x, alpha):
    """(N, C, H, W) -> (N, C*alpha*alpha, HP*WP) sliding windows (stride 1, valid).

    K is the leading (sublane) axis so no 128-lane padding of K is needed in HBM.
    k index = c*alpha*alpha + a*alpha + b, q index = qi*WP + qj.
    """
    n, c, h, w = x.shape
    hp, wp = h - alpha + 1, w - alpha + 1
    cols = []
    for a in range(alpha):
        for b in range(alpha):
            cols.append(x[:, :, a:a + hp, b:b + wp])        # (N, C, HP, WP)
    col = jnp.stack(cols, axis=2)                           # (N, C, a*a, HP, WP)
    return col.reshape(n, c * alpha * alpha, hp * wp)       # (N, K, HW')


def _patches(x, alpha):
    """(N, C, H, W) -> (N, P, C*alpha*alpha): alpha-strided grid of alpha x alpha patches."""
    n, c, h, w = x.shape
    ps = []
    for r in range(0, h, alpha):
        for s in range(0, w, alpha):
            ps.append(x[:, :, r:r + alpha, s:s + alpha].reshape(n, -1))  # (N, K)
    return jnp.stack(ps, axis=1)                            # (N, P, K)


def _sim_kernel(f1_ref, d1_ref, f2_ref, d2_ref, cos_ref):
    # Blocks: f*_ref (1, Kp, TQ) and d*_ref (1, Pp, Kp) in matmul dtype,
    # cos_ref (1, 1, TQ) f32.  K lives on the sublane axis of f (RHS already in
    # (K, N) MXU orientation) and on the lane axis of d (LHS in (M, K) orientation),
    # so no transposes are needed; accumulation is f32 on the MXU.
    f1 = f1_ref[0]                  # (Kp, TQ)
    d1 = d1_ref[0]                  # (Pp, Kp)
    f2 = f2_ref[0]
    d2 = d2_ref[0]
    dn = (((1,), (0,)), ((), ()))   # contract the (zero-padded) K axis
    # map_1: flat = y, depth = y'; map_2: roles swapped.  out_scale applied in f32.
    m1 = jax.lax.dot_general(d1, f1, dn, preferred_element_type=jnp.float32) * OUT_SCALE
    m2 = jax.lax.dot_general(d2, f2, dn, preferred_element_type=jnp.float32) * OUT_SCALE
    # Cosine similarity over the patch axis (sublanes).  Padded P rows and padded
    # query columns are all-zero, so they contribute nothing (padded columns give 0).
    num = jnp.sum(m1 * m2, axis=0, keepdims=True)           # (1, TQ)
    w1 = jnp.sum(m1 * m1, axis=0, keepdims=True)
    w2 = jnp.sum(m2 * m2, axis=0, keepdims=True)
    # nn.CosineSimilarity semantics: clamp each norm to eps separately.
    denom = jnp.maximum(jnp.sqrt(w1), EPS) * jnp.maximum(jnp.sqrt(w2), EPS)
    cos_ref[0] = num / denom


def similarity_loss(y, y_prime, alpha=ALPHA, matmul_dtype=jnp.bfloat16):
    if y.shape != y_prime.shape:
        raise ValueError("y and y_prime must have the same shape")
    n, c, h, w = y.shape
    if h % alpha or w % alpha:
        # TODO(synk): PyTorch boundary-padding branch (H or W not divisible by alpha).
        raise NotImplementedError(
            "H and W must be divisible by alpha; the boundary-padding branch of the "
            "PyTorch module is not implemented")

    hp, wp = h - alpha + 1, w - alpha + 1
    hwp = hp * wp
    k = c * alpha * alpha
    p = (h // alpha) * (w // alpha)

    kp = _round_up(k, 16)                # contraction dim: sublane pad only, NOT 128 lanes
    pp = _round_up(p, 16)                # patch dim: sublane granularity, NOT 128
    tq = min(512, _round_up(hwp, 128))   # lane-dense query tile (multiple of 128)
    hwp_pad = _round_up(hwp, tq)
    n_q = hwp_pad // tq

    def prep_flat(x):
        f = _im2col_kq(x, alpha)                                    # (N, K, HW') f32
        f = jnp.pad(f, ((0, 0), (0, kp - k), (0, hwp_pad - hwp)))   # zero-pad K, HW'
        return f.astype(matmul_dtype)

    def prep_depth(x):
        d = _patches(x, alpha)                                      # (N, P, K) f32
        d = jnp.pad(d, ((0, 0), (0, pp - p), (0, kp - k)))          # zero-pad P, K
        return d.astype(matmul_dtype)

    f1 = prep_flat(y)            # map_1: flat = y
    d1 = prep_depth(y_prime)     # map_1: depth = y_prime
    f2 = prep_flat(y_prime)      # map_2: flat = y_prime
    d2 = prep_depth(y)           # map_2: depth = y

    cos = pl.pallas_call(
        _sim_kernel,
        out_shape=jax.ShapeDtypeStruct((n, 1, hwp_pad), jnp.float32),
        grid_spec=pltpu.PrefetchScalarGridSpec(
            num_scalar_prefetch=0,
            grid=(n, n_q),   # batch x query-tile; d blocks are reused across q steps
            in_specs=[
                pl.BlockSpec((1, kp, tq), lambda i, q: (i, 0, q)),
                pl.BlockSpec((1, pp, kp), lambda i, q: (i, 0, 0)),
                pl.BlockSpec((1, kp, tq), lambda i, q: (i, 0, q)),
                pl.BlockSpec((1, pp, kp), lambda i, q: (i, 0, 0)),
            ],
            out_specs=pl.BlockSpec((1, 1, tq), lambda i, q: (i, 0, q)),
        ),
        compiler_params=pltpu.CompilerParams(
            dimension_semantics=("parallel", "parallel"),
            # Per-step footprint is a few MiB even at tq=512; 32 MiB raises v5e's
            # 16 MiB scoped default and stays well within v7x's 64 MiB physical VMEM.
            vmem_limit_bytes=32 * 1024 * 1024,
        ),
    )(f1, d1, f2, d2)

    # loss.mean() over (N, H', W'): drop the zero-padded query columns first.
    return jnp.mean(cos[:, 0, :hwp])


def _reference(y, y_prime, alpha=ALPHA):
    """Pure-JAX f32 reference mirroring the PyTorch forward."""
    f1 = _im2col_kq(y, alpha)
    d1 = _patches(y_prime, alpha)
    f2 = _im2col_kq(y_prime, alpha)
    d2 = _patches(y, alpha)
    m1 = jnp.einsum('npk,nkq->npq', d1, f1) * OUT_SCALE
    m2 = jnp.einsum('npk,nkq->npq', d2, f2) * OUT_SCALE
    num = jnp.sum(m1 * m2, axis=1)
    n1 = jnp.maximum(jnp.sqrt(jnp.sum(m1 * m1, axis=1)), EPS)
    n2 = jnp.maximum(jnp.sqrt(jnp.sum(m2 * m2, axis=1)), EPS)
    return jnp.mean(num / (n1 * n2))


if __name__ == "__main__":
    key = jax.random.PRNGKey(0)
    k1, k2 = jax.random.split(key)
    # Small shapes; H, W divisible by alpha=3 so the PyTorch padding branch is a no-op.
    N, C, H, W = 2, 4, 12, 12
    y = jax.random.normal(k1, (N, C, H, W), dtype=jnp.float32)
    y_prime = jax.random.normal(k2, (N, C, H, W), dtype=jnp.float32)

    ref = _reference(y, y_prime)

    # Default bf16 MXU path (relaxed tolerance vs f32 reference).
    loss = similarity_loss(y, y_prime)
    jax.block_until_ready(loss)
    assert jnp.allclose(loss, ref, rtol=2e-2, atol=2e-2), (loss, ref)

    # f32 MXU path for exact parity with the f32 PyTorch module.
    loss_f32 = similarity_loss(y, y_prime, matmul_dtype=jnp.float32)
    jax.block_until_ready(loss_f32)
    assert jnp.allclose(loss_f32, ref, rtol=1e-5, atol=1e-5), (loss_f32, ref)

    print("KERNEL_OK")
</pallas_src>

<mosaic_0001>
module attributes {stable_mosaic.version = 11 : i64} {
  func.func @_sim_kernel(%arg0: i32, %arg1: i32, %arg2: memref<1x48x128xbf16, #tpu.memory_space<vmem>>, %arg3: memref<1x16x48xbf16, #tpu.memory_space<vmem>>, %arg4: memref<1x48x128xbf16, #tpu.memory_space<vmem>>, %arg5: memref<1x16x48xbf16, #tpu.memory_space<vmem>>, %arg6: memref<1x1x128xf32, #tpu.memory_space<vmem>>) attributes {dimension_semantics = [#tpu.dimension_semantics<parallel>, #tpu.dimension_semantics<parallel>], iteration_bounds = array<i64: 2, 1>, scalar_prefetch = 0 : i64, scratch_operands = 0 : i64, tpu.core_type = #tpu.core_type<tc>, window_params = [{transform_indices = @transform_0, window_bounds = array<i64: 1, 48, 128>}, {transform_indices = @transform_1, window_bounds = array<i64: 1, 16, 48>}, {transform_indices = @transform_2, window_bounds = array<i64: 1, 48, 128>}, {transform_indices = @transform_3, window_bounds = array<i64: 1, 16, 48>}, {transform_indices = @transform_4, window_bounds = array<i64: 1, 1, 128>}]} {
    %c0 = arith.constant 0 : index
    %c0_0 = arith.constant 0 : index
    %c0_1 = arith.constant 0 : index
    %0 = vector.load %arg2[%c0, %c0_0, %c0_1] : memref<1x48x128xbf16, #tpu.memory_space<vmem>>, vector<1x48x128xbf16>
    %1 = vector.shape_cast %0 : vector<1x48x128xbf16> to vector<48x128xbf16>
    %c0_2 = arith.constant 0 : index
    %c0_3 = arith.constant 0 : index
    %c0_4 = arith.constant 0 : index
    %2 = vector.load %arg3[%c0_2, %c0_3, %c0_4] : memref<1x16x48xbf16, #tpu.memory_space<vmem>>, vector<1x16x48xbf16>
    %3 = vector.shape_cast %2 : vector<1x16x48xbf16> to vector<16x48xbf16>
    %c0_5 = arith.constant 0 : index
    %c0_6 = arith.constant 0 : index
    %c0_7 = arith.constant 0 : index
    %4 = vector.load %arg4[%c0_5, %c0_6, %c0_7] : memref<1x48x128xbf16, #tpu.memory_space<vmem>>, vector<1x48x128xbf16>
    %5 = vector.shape_cast %4 : vector<1x48x128xbf16> to vector<48x128xbf16>
    %c0_8 = arith.constant 0 : index
    %c0_9 = arith.constant 0 : index
    %c0_10 = arith.constant 0 : index
    %6 = vector.load %arg5[%c0_8, %c0_9, %c0_10] : memref<1x16x48xbf16, #tpu.memory_space<vmem>>, vector<1x16x48xbf16>
    %7 = vector.shape_cast %6 : vector<1x16x48xbf16> to vector<16x48xbf16>
    %cst = arith.constant dense<0.000000e+00> : vector<16x128xf32>
    %8 = tpu.matmul %3, %1, %cst {dimension_numbers = #tpu.dot_dimension_numbers<[1], [0], [0], [1], [0, 0, 1, 1], [], []>} : vector<16x48xbf16>, vector<48x128xbf16>, vector<16x128xf32> -> vector<16x128xf32>
    %cst_11 = arith.constant 1.000000e-03 : f32
    %9 = vector.broadcast %cst_11 : f32 to vector<16x128xf32>
    %10 = arith.mulf %8, %9 : vector<16x128xf32>
    %cst_12 = arith.constant dense<0.000000e+00> : vector<16x128xf32>
    %11 = tpu.matmul %7, %5, %cst_12 {dimension_numbers = #tpu.dot_dimension_numbers<[1], [0], [0], [1], [0, 0, 1, 1], [], []>} : vector<16x48xbf16>, vector<48x128xbf16>, vector<16x128xf32> -> vector<16x128xf32>
    %cst_13 = arith.constant 1.000000e-03 : f32
    %12 = vector.broadcast %cst_13 : f32 to vector<16x128xf32>
    %13 = arith.mulf %11, %12 : vector<16x128xf32>
    %14 = arith.mulf %10, %13 : vector<16x128xf32>
    %cst_14 = arith.constant dense<0.000000e+00> : vector<128xf32>
    %15 = vector.multi_reduction <add>, %14, %cst_14 [0] : vector<16x128xf32> to vector<128xf32>
    %16 = vector.shape_cast %15 : vector<128xf32> to vector<1x128xf32>
    %17 = arith.mulf %10, %10 : vector<16x128xf32>
    %cst_15 = arith.constant dense<0.000000e+00> : vector<128xf32>
    %18 = vector.multi_reduction <add>, %17, %cst_15 [0] : vector<16x128xf32> to vector<128xf32>
    %19 = vector.shape_cast %18 : vector<128xf32> to vector<1x128xf32>
    %20 = arith.mulf %13, %13 : vector<16x128xf32>
    %cst_16 = arith.constant dense<0.000000e+00> : vector<128xf32>
    %21 = vector.multi_reduction <add>, %20, %cst_16 [0] : vector<16x128xf32> to vector<128xf32>
    %22 = vector.shape_cast %21 : vector<128xf32> to vector<1x128xf32>
    %23 = math.sqrt %19 : vector<1x128xf32>
    %cst_17 = arith.constant 9.99999993E-9 : f32
    %24 = vector.broadcast %cst_17 : f32 to vector<1x128xf32>
    %25 = arith.maximumf %23, %24 : vector<1x128xf32>
    %26 = math.sqrt %22 : vector<1x128xf32>
    %cst_18 = arith.constant 9.99999993E-9 : f32
    %27 = vector.broadcast %cst_18 : f32 to vector<1x128xf32>
    %28 = arith.maximumf %26, %27 : vector<1x128xf32>
    %29 = arith.mulf %25, %28 : vector<1x128xf32>
    %30 = arith.divf %16, %29 : vector<1x128xf32>
    %c0_19 = arith.constant 0 : index
    %c0_20 = arith.constant 0 : index
    %c0_21 = arith.constant 0 : index
    %31 = vector.load %arg6[%c0_19, %c0_20, %c0_21] : memref<1x1x128xf32, #tpu.memory_space<vmem>>, vector<1x1x128xf32>
    %32 = vector.shape_cast %31 : vector<1x1x128xf32> to vector<1x128xf32>
    %33 = vector.shape_cast %30 : vector<1x128xf32> to vector<1x1x128xf32>
    tpu.vector_store %arg6[%c0_19, %c0_20, %c0_21], %33 {strides = array<i32>} : memref<1x1x128xf32, #tpu.memory_space<vmem>>, vector<1x1x128xf32>,
    return
  }
  func.func @transform_0(%arg0: i32, %arg1: i32) -> (i32, i32, i32) {
    %c0_i32 = arith.constant 0 : i32
    %c0_i32_0 = arith.constant 0 : i32
    return %arg0, %c0_i32, %arg1 : i32, i32, i32
  }
  func.func @transform_1(%arg0: i32, %arg1: i32) -> (i32, i32, i32) {
    %c0_i32 = arith.constant 0 : i32
    %c0_i32_0 = arith.constant 0 : i32
    %c0_i32_1 = arith.constant 0 : i32
    return %arg0, %c0_i32, %c0_i32_0 : i32, i32, i32
  }
  func.func @transform_2(%arg0: i32, %arg1: i32) -> (i32, i32, i32) {
    %c0_i32 = arith.constant 0 : i32
    %c0_i32_0 = arith.constant 0 : i32
    return %arg0, %c0_i32, %arg1 : i32, i32, i32
  }
  func.func @transform_3(%arg0: i32, %arg1: i32) -> (i32, i32, i32) {
    %c0_i32 = arith.constant 0 : i32
    %c0_i32_0 = arith.constant 0 : i32
    %c0_i32_1 = arith.constant 0 : i32
    return %arg0, %c0_i32, %c0_i32_0 : i32, i32, i32
  }
  func.func @transform_4(%arg0: i32, %arg1: i32) -> (i32, i32, i32) {
    %c0_i32 = arith.constant 0 : i32
    %c0_i32_0 = arith.constant 0 : i32
    return %arg0, %c0_i32, %arg1 : i32, i32, i32
  }
}

</mosaic_0001>

<bundles_post_ra>
// kernel: tpu_custom_call.1
= control target key start
LH: loop header
LB: loop body
LE: loop exit
PB: predicated region body
PF: predicated region fallthrough
CT: control target
= control target key end

     0   :  { %s1325_s0 = inlined_call_operand.hbm [shape: bf16[2,48,128], index: 0, kind: input, shape index: {}]   ;;  %s1326_s1 = inlined_call_operand.hbm [shape: bf16[2,16,48], index: 1, kind: input, shape index: {}]   ;;  %s1327_s2 = inlined_call_operand.hbm [shape: bf16[2,48,128], index: 2, kind: input, shape index: {}]   ;;  %s1328_s3 = inlined_call_operand.hbm [shape: bf16[2,16,48], index: 3, kind: input, shape index: {}]   ;;  %s1329_s4 = inlined_call_operand.hbm [shape: f32[2,1,128], index: 4, kind: output, shape index: {}]  }
   0x1   :  { %1341 = sst [smem:[#allocation20_spill]] %s1325_s0 }
   0x2   :  { %1342 = sst [smem:[#allocation21_spill]] %s1326_s1 }
   0x3   :  { %1343 = sst [smem:[#allocation22_spill]] %s1327_s2 }
   0x4   :  { %9 = vsyncpa [#allocation3], 0 }
   0x5   :  { %11 = vsyncpa [#allocation3 + $0x1], 0 }
   0x6   :  { %12 = vsyncpa [#allocation6], 0 }
   0x7   :  { %14 = vsyncpa [#allocation6 + $0x1], 0 }
   0x8   :  { %15 = vsyncpa [#allocation9], 0 }
   0x9   :  { %17 = vsyncpa [#allocation9 + $0x1], 0 }
   0xa   :  { %18 = vsyncpa [#allocation4], 0 }
   0xb   :  { %20 = vsyncpa [#allocation4 + $0x1], 0  ;;  %s1108_s15 = smov 0   ;;  %s1110_s16 = smov 0  }
   0xc   :  { %s1112_s17 = smov 0   ;;  %s1114_s18 = smov 0  }
   0xd   :  { %s1116_s19 = smov 0   ;;  %s1118_s20 = smov 0  }
   0xe LB: > { %1344 = sst [smem:[#allocation15_spill]] %s1060_s17  ;;  %s1139_s21 = sadd.s32 4294967295, %s1072_s20   ;;  %s1072_s20 = sphi %s1118_s20, %s26_s20   ;;  %s1068_s19 = sphi %s1116_s19, %s1371_s19   ;;  %s1064_s18 = sphi %s1114_s18, %s1370_s18   ;;  %s1060_s17 = sphi %s1112_s17, %s1366_s17   ;;  %s1056_s16 = sphi %s1110_s16, %s1369_s16   ;;  %s1052_s15 = sphi %s1108_s15, %s1368_s15  }
   0xf   : > { %1345 = sst [smem:[#allocation16_spill]] %s1072_s20  ;;  %s715_s22 = sadd.s32 4294967294, %s1072_s20  }
  0x10   : > { %s38_s23 = sadd.s32 1, %s1068_s19  ;;  %s47_s24 = sadd.s32 1, %s1060_s17 }
  0x11   : > { %p40_p0 = scmp.ge.s32.totalorder %s38_s23, 2  ;;  %p54_p1 = scmp.ne.s32.totalorder %s1060_s17, %s1056_s16 }
  0x12   : > { %p55_p2 = scmp.eq.s32.totalorder %s1072_s20, 0  ;;  %p60_p3 = scmp.ne.s32.totalorder %s1056_s16, %s1052_s15 }
  0x13   : > { %s1373_s23 = smov (%p40_p0, %s38_s23), 0  ;;  %p61_p5 = scmp.eq.s32.totalorder %s1139_s21, 0 }
  0x14   : > { %1346 = sst [smem:[#allocation17_spill]] %s1373_s23  ;;  %p1151_p4 = por %p55_p2, %p54_p1 }
  0x15   : > { %s42_s26 = ssub.s32 %s1068_s19, %s1373_s23  ;;  %p166_p6 = scmp.eq.s32.totalorder %s1139_s21, 1 }
  0x16   : > { %p45_p7 = scmp.eq.s32.totalorder %s42_s26, 0  ;;  %p1159_p8 = por %p61_p5, %p60_p3 }
  0x17   : > { %p1163_p9 = por %p166_p6, %p54_p1  ;;  %p172_p10 = scmp.eq.s32.totalorder %s715_s22, 1 }
  0x18   : > { %s1168_s29 = scalar_select %p45_p7, %s1060_s17, %s47_s24  }
  0x19   : > { %p1170_p11 = por %p172_p10, %p60_p3  ;;  %p804_p13 = scmp.lt.s32.totalorder %s1072_s20, 2 }
  0x1a   : > { %1350 = sst [smem:[#allocation18_spill]] %s1168_s29  ;;  %s1177_s5 = sand.u32 1, %s1060_s17  }
  0x1b   : > { %s1351_s30 = scalar_select %p1170_p11, 1, 0 }
  0x1c   : > { %p1181_p0 = pnand %p804_p13, %p1151_p4  ;;  %s214_s7 = sand.u32 1, %s1072_s20  }
  0x1d   : > { %1352 = sst [smem:[#allocation19_spill]] %s1351_s30  ;;  %s1330_s8 = sshll.u32 %s1177_s5, 3 }
  0x1e   : > { %s1331_s9 = sshll.u32 %s1068_s19, 7  ;;  %s218_s10 = scalar_lea.vmem [#allocation5], %s1330_s8 }
  0x1f   : > { %s225_s11 = sshll.u32 %s218_s10, 4  ;;  %s1354_s1 = sld [smem:[#allocation21_spill]]  ;;  %s226_s11 = int_to_ptr.vmem [resolvable:$true] %s225_s11 }
  0x20   : > { %s1195_s22 = scalar_lea.sflag [#allocation6], %s214_s7  ;;  %p874_p1 = pneg %p1181_p0 }
  0x21   : > { %s885_s24 = scalar_lea.vmem %s226_s11, 128  ;;  %s1074_s25 = smov [#allocation5]  }
  0x22   : > { %p886_p2 = scmp.ne.s32.totalorder %s226_s11, %s885_s24  ;;  %s890_s26 = sshll.u32 %s1074_s25, 4  ;;  %s891_s26 = int_to_ptr.vmem [resolvable:$false] %s890_s26 }
  0x23   : > { %s892_s10 = scalar_lea.vmem %s891_s26, 256  ;;  %p893_p5 = scmp.lt.s32.totalorder %s226_s11, %s891_s26 }
  0x24   : > { %p888_p3 = pnand %p886_p2, %p874_p1  ;;  %p894_p6 = scmp.lt.s32.totalorder %s892_s10, %s885_s24 }
  0x25   : > { %s224_s14 = scalar_lea.hbm %s1354_s1, %s1331_s9 }
  0x26   : > { %p889_p4 = pneg %p888_p3  ;;  %p895_p7 = por %p894_p6, %p893_p5 }
  0x28   : > { %p896_p10 = pnand %p895_p7, %p889_p4 }
  0x2a   : > { %899 = shalt.err (!%p896_p10)
}
  0x2b   : > { %s1334_s12 = smov 64   ;;  %s1336_s7 = smov 4  }
  0x2c   : > { %793 = dma.hbm_to_vmem [thread:$0]  (!%p1181_p0), %s224_s14, 128, %s226_s11, %s1195_s22, %s1334_s12, %s1334_s12, %s1336_s7  }
  0x2d   : > { %p726_p13 = scmp.ge.s32.totalorder %s1072_s20, 1  ;;  %p276_p2 = scmp.lt.s32.totalorder %s1072_s20, 3 }
  0x2e   : > { %s772_s24 = smul.u32 24, %s1177_s5  ;;  %s1356_s0 = sld [smem:[#allocation20_spill]] }
  0x2f   : > { %p1210_p3 = pnand %p726_p13, %p276_p2  ;;  %s773_s25 = smul.u32 384, %s1068_s19 }
  0x30   : > { %s196_s9 = scalar_lea.vmem [#allocation2], %s772_s24  ;;  %s1357_s2 = sld [smem:[#allocation22_spill]] }
  0x31   : > { %s204_s1 = sshll.u32 %s196_s9, 4  ;;  %s193_s11 = scalar_lea.sflag [#allocation3], %s1177_s5  ;;  %s205_s1 = int_to_ptr.vmem [resolvable:$true] %s204_s1 }
  0x32   : > { %s913_s14 = scalar_lea.vmem %s205_s1, 384  ;;  %s1077_s12 = smov [#allocation2]  }
  0x33   : > { %p914_p4 = scmp.ne.s32.totalorder %s205_s1, %s913_s14  ;;  %s918_s7 = sshll.u32 %s1077_s12, 4  ;;  %s919_s7 = int_to_ptr.vmem [resolvable:$false] %s918_s7 }
  0x34   : > { %s203_s8 = scalar_lea.hbm %s1356_s0, %s773_s25  ;;  %s920_s26 = scalar_lea.vmem %s919_s7, 768 }
  0x35   : > { %p916_p5 = pnand %p914_p4, %p874_p1  ;;  %p921_p7 = scmp.lt.s32.totalorder %s205_s1, %s919_s7 }
  0x36   : > { %s1222_s17 = scalar_lea.hbm %s1357_s2, %s773_s25  ;;  %p922_p10 = scmp.lt.s32.totalorder %s920_s26, %s913_s14 }
  0x37   : > { %p917_p6 = pneg %p916_p5 }
  0x38   : > { %p923_p13 = por %p922_p10, %p921_p7 }
  0x3a   : > { %p924_p2 = pnand %p923_p13, %p917_p6 }
  0x3c   : > { %927 = shalt.err (!%p924_p2)
}
  0x3d   : > { %s1358_s23 = smov 4   ;;  %s1359_s29 = smov 64  }
  0x3e   : > { %790 = dma.hbm_to_vmem [thread:$0]  (!%p1181_p0), %s203_s8, 384, %s205_s1, %s193_s11, %s1359_s29, %s1359_s29, %s1358_s23  }
  0x3f   : > { %s239_s9 = scalar_lea.vmem [#allocation7], %s772_s24  ;;  %s1360_s10 = sshll.u32 %s1068_s19, 7 }
  0x40   : > { %s247_s25 = sshll.u32 %s239_s9, 4  ;;  %s1238_s7 = scalar_lea.hbm %s1328_s3, %s1360_s10  ;;  %s248_s25 = int_to_ptr.vmem [resolvable:$true] %s247_s25 }
  0x41   : > { %s1361_s14 = sshll.u32 %s1177_s5, 3  ;;  %s941_s20 = scalar_lea.vmem %s248_s25, 384 }
  0x42   : > { %s261_s26 = scalar_lea.vmem [#allocation8], %s1361_s14  ;;  %p942_p4 = scmp.ne.s32.totalorder %s248_s25, %s941_s20 }
  0x43   : > { %s268_s2 = sshll.u32 %s261_s26, 4  ;;  %s1078_s30 = smov [#allocation7]   ;;  %s269_s2 = int_to_ptr.vmem [resolvable:$true] %s268_s2 }
  0x44   : > { %p944_p5 = pnand %p942_p4, %p874_p1  ;;  %s946_s1 = sshll.u32 %s1078_s30, 4  ;;  %s947_s1 = int_to_ptr.vmem [resolvable:$false] %s946_s1 }
  0x45   : > { %s948_s8 = scalar_lea.vmem %s947_s1, 768  ;;  %p949_p7 = scmp.lt.s32.totalorder %s248_s25, %s947_s1 }
  0x46   : > { %p945_p6 = pneg %p944_p5  ;;  %p950_p10 = scmp.lt.s32.totalorder %s948_s8, %s941_s20 }
  0x48   : > { %p951_p13 = por %p950_p10, %p949_p7 }
  0x4a   : > { %p952_p2 = pnand %p951_p13, %p945_p6 }
  0x4c   : > { %955 = shalt.err (!%p952_p2)
}
  0x4d   : > { %796 = dma.hbm_to_vmem [thread:$0]  (!%p1181_p0), %s1222_s17, 384, %s248_s25, %s1195_s22, %s1359_s29, %s1359_s29, %s1358_s23  }
  0x4e   : > { %s258_s0 = scalar_lea.sflag [#allocation9], %s1177_s5  ;;  %s969_s30 = scalar_lea.vmem %s269_s2, 128 }
  0x4f   : > { %p970_p4 = scmp.ne.s32.totalorder %s269_s2, %s969_s30  ;;  %s1079_s20 = smov [#allocation8]  }
  0x50   : > { %s974_s24 = sshll.u32 %s1079_s20, 4  ;;  %s975_s24 = int_to_ptr.vmem [resolvable:$false] %s974_s24 }
  0x51   : > { %p972_p5 = pnand %p970_p4, %p874_p1  ;;  %s976_s11 = scalar_lea.vmem %s975_s24, 256 }
  0x52   : > { %p977_p6 = scmp.lt.s32.totalorder %s269_s2, %s975_s24  ;;  %p978_p10 = scmp.lt.s32.totalorder %s976_s11, %s969_s30 }
  0x53   : > { %p973_p7 = pneg %p972_p5 }
  0x54   : > { %p979_p13 = por %p978_p10, %p977_p6 }
  0x56   : > { %p980_p2 = pnand %p979_p13, %p973_p7 }
  0x58   : > { %983 = shalt.err (!%p980_p2)
}
  0x59   : > { %799 = dma.hbm_to_vmem [thread:$0]  (!%p1181_p0), %s1238_s7, 128, %s269_s2, %s258_s0, %s1359_s29, %s1359_s29, %s1358_s23  }
  0x5a   : > { %280 = sbr.rel (%p1210_p3) target bundleno = 383 (0x17f), region = 36  ;;  %s1265_s17 = sand.u32 (!%p1210_p3), 1, %s1056_s16  }
  0x5b   : > { %s776_s5 = smul.u32 (!%p1210_p3), 24, %s1265_s17  ;;  %s283_s22 = scalar_lea.sflag (!%p1210_p3), [#allocation3], %s1265_s17 }
  0x5d   : > { %s286_s9 = scalar_lea.vmem (!%p1210_p3), [#allocation2], %s776_s5 }
  0x5f   : > { %1035 = dma.done.wait (%p1159_p8), %s283_s22, 384  }
  0x60   : > { %1037 = vsyncadd (%p1159_p8), %s283_s22, 4294966912  ;;  %s291_s2 = sand.u32 1, %s1139_s21   ;;  %s727_s6 = sshll.u32 %s1265_s17, 3 }
  0x61   : > { %s292_s13 = scalar_lea.sflag [#allocation6], %s291_s2  ;;  %s295_s23 = scalar_lea.vmem [#allocation5], %s727_s6 }
  0x62   : > { %1039 = dma.done.wait (%p1159_p8), %s292_s13, 512  }
  0x63   : > { %1041 = vsyncadd (%p1159_p8), %s292_s13, 4294966784  ;;  %s304_s29 = scalar_lea.vmem [#allocation7], %s776_s5  ;;  %s310_s25 = scalar_lea.sflag [#allocation9], %s1265_s17 }
  0x64   : > { %s313_s10 = scalar_lea.vmem [#allocation8], %s727_s6 }
  0x65   : > { %1043 = dma.done.wait (%p1159_p8), %s310_s25, 128  }
  0x66   : > { %1045 = vsyncadd (%p1159_p8), %s310_s25, 4294967168  ;;  %v1080_v0 = vmov 0.0   ;;  %vm1081_vm0 = vmmov 0   ;;  %v858_v1 = vld [vmem:[%s286_s9 + $0x10] sm:$0xff]   ;;  %v860_v3 = vld [vmem:[%s286_s9 + $0x8] sm:$0xff]   ;;  %vm392_vm1 = vcmask 392192  }
  0x67   : > { %752 = vmatprep.subr.bf16.mxu0 %v1080_v0  ;;  %762 = vmatprep.subr.bf16.mxu1 %v1080_v0  ;;  %v859_v2 = vld [vmem:[%s304_s29 + $0x10] sm:$0xff]   ;;  %v861_v4 = vld [vmem:[%s304_s29 + $0x8] sm:$0xff]   ;;  %v862_v5 = vld [vmem:[%s286_s9] sm:$0xff]   ;;  %s739_s21 = sshll.u32 %s1064_s18, 4  ;;  %s351_s27 = scalar_lea.vmem [#allocation10], %s1265_s17 }
  0x68   : > { %758 = vmatprep.mubr.msk.bf16.mxu0 %vm1081_vm0, %v1080_v0  ;;  %768 = vmatprep.mubr.msk.bf16.mxu1 %vm1081_vm0, %v1080_v0  ;;  %v863_v6 = vld [vmem:[%s304_s29] sm:$0xff]   ;;  %s569_s12 = sshll.u32 %s351_s27, 4  ;;  %s567_s26 = scalar_lea.hbm %s1329_s4, %s739_s21  ;;  %s570_s12 = int_to_ptr.vmem [resolvable:$true] %s569_s12 }
  0x69   : > { %753 = vmatpush3.bf16.msra.mxu0 %v858_v1  ;;  %763 = vmatpush3.bf16.msra.mxu1 %v859_v2  ;;  %v864_v7 = vld [vmem:[%s295_s23] sm:$0xff]   ;;  %s556_s1 = scalar_lea.sflag [#allocation4], %s1265_s17  ;;  %s984_s8 = scalar_lea.vmem %s570_s12, 16 }
  0x6a   : > { %754 = vmatprep.subr.bf16.mxu0 %v1080_v0  ;;  %764 = vmatprep.subr.bf16.mxu1 %v1080_v0  ;;  %v865_v8 = vld [vmem:[%s313_s10] sm:$0xff]   ;;  %p985_p8 = scmp.ne.s32.totalorder %s570_s12, %s984_s8  ;;  %s1082_s0 = smov [#allocation10]  }
  0x6b   : > { %s988_s30 = sshll.u32 %s1082_s0, 4  ;;  %s989_s30 = int_to_ptr.vmem [resolvable:$false] %s988_s30 }
  0x6c   : > { %p986_p0 = pnand %p985_p8, %p1163_p9  ;;  %s990_s18 = scalar_lea.vmem %s989_s30, 32 }
  0x6d   : > { %755 = vmatpush3.bf16.msra.mxu0 %v860_v3  ;;  %765 = vmatpush3.bf16.msra.mxu1 %v861_v4  ;;  %p991_p3 = scmp.lt.s32.totalorder %s570_s12, %s989_s30  ;;  %p992_p4 = scmp.lt.s32.totalorder %s990_s18, %s984_s8 }
  0x6e   : > { %756 = vmatprep.subr.bf16.mxu0 %v1080_v0  ;;  %766 = vmatprep.subr.bf16.mxu1 %v1080_v0  ;;  %p987_p1 = pneg %p986_p0 }
  0x6f   : > { %p993_p5 = por %p992_p4, %p991_p3 }
  0x71   : > { %757 = vmatpush3.bf16.msra.mxu0 %v862_v5  ;;  %767 = vmatpush3.bf16.msra.mxu1 %v863_v6  ;;  %p994_p7 = pnand %p993_p5, %p987_p1 }
  0x74   : > { %759 = vmatmul.mubr.msk.bf16.vlgmr.msra.gmra.mxu0 %vm392_vm1, %v864_v7  ;;  %769 = vmatmul.mubr.msk.bf16.vlgmr.msra.gmra.mxu1 %vm392_vm1, %v865_v8 }
 0x134   : > { %v430_v9 = vpop.f32.mrf.mxu0  ;;  %v499_v10 = vpop.f32.mrf.mxu1 }
 0x135   : > { %v437_v12 = vmul.f32 0.001, %v430_v9  ;;  %v506_v14 = vmul.f32 0.001, %v499_v10 }
 0x136   : > { %v760_v11 = vpop.f32.mrf.mxu0  ;;  %v770_v13 = vpop.f32.mrf.mxu1 }
 0x137   : > { %v517_v20 = vmul.f32 %v437_v12, %v437_v12  ;;  %v526_v23 = vmul.f32 %v506_v14, %v506_v14  ;;  %v508_v40 = vmul.f32 %v506_v14, %v437_v12 }
 0x138   : > { %v433_v15 = vpop.f32.mrf.mxu0  ;;  %v502_v17 = vpop.f32.mrf.mxu1 }
 0x139   : > { %v438_v16 = vmul.f32 0.001, %v433_v15  ;;  %v507_v18 = vmul.f32 0.001, %v502_v17 }
 0x13a   : > { %v761_v19 = vpop.f32.mrf.mxu0  ;;  %v771_v22 = vpop.f32.mrf.mxu1 }
 0x13b   : > { %v518_v21 = vmul.f32 %v438_v16, %v438_v16  ;;  %v527_v24 = vmul.f32 %v507_v18, %v507_v18  ;;  %v509_v39 = vmul.f32 %v507_v18, %v438_v16 }
 0x13d   : > { %v519_v25 = vadd.f32 %v518_v21, %v517_v20  ;;  %v528_v26 = vadd.f32 %v527_v24, %v526_v23  ;;  %v510_v41 = vadd.f32 %v509_v39, %v508_v40 }
 0x13f   : > { %v520_v27 = vrot.slane %v519_v25, 4  ;;  %v529_v28 = vrot.slane %v528_v26, 4  ;;  %v511_v46 = vrot.slane %v510_v41, 4 }
 0x141   : > { %v521_v29 = vadd.f32 %v520_v27, %v519_v25  ;;  %v530_v30 = vadd.f32 %v529_v28, %v528_v26  ;;  %v512_v54 = vadd.f32 %v511_v46, %v510_v41 }
 0x143   : > { %v522_v31 = vrot.slane %v521_v29, 2  ;;  %v531_v32 = vrot.slane %v530_v30, 2  ;;  %v513_v57 = vrot.slane %v512_v54, 2 }
 0x145   : > { %v523_v33 = vadd.f32 %v522_v31, %v521_v29  ;;  %v532_v34 = vadd.f32 %v531_v32, %v530_v30  ;;  %v514_v58 = vadd.f32 %v513_v57, %v512_v54 }
 0x147   : > { %v524_v35 = vrot.slane %v523_v33, 1  ;;  %v533_v36 = vrot.slane %v532_v34, 1  ;;  %v515_v59 = vrot.slane %v514_v58, 1 }
 0x149   : > { %v525_v37 = vadd.f32 %v524_v35, %v523_v33  ;;  %v534_v38 = vadd.f32 %v533_v36, %v532_v34  ;;  %v516_v60 = vadd.f32 %v515_v59, %v514_v58 }
 0x14b   : > { %866 = vrsqrt.f32 %v525_v37  ;;  %vm537_vm2 = vcmp.eq.f32.partialorder %v525_v37, inf  ;;  %v540_v45 = vand.u32 2147483648, %v525_v37  ;;  %vm539_vm3 = vcmp.eq.f32.partialorder %v525_v37, 0.0 }
 0x14c   : > { %868 = vrsqrt.f32 %v534_v38  ;;  %vm545_vm4 = vcmp.eq.f32.partialorder %v534_v38, inf  ;;  %v548_v49 = vand.u32 2147483648, %v534_v38  ;;  %vm547_vm5 = vcmp.eq.f32.partialorder %v534_v38, 0.0 }
 0x158   : > { %v867_v42 = vpop.eup %866 }
 0x159   : > { %v869_v43 = vpop.eup %868  ;;  %v536_v44 = vmul.f32 %v867_v42, %v525_v37 }
 0x15a   : > { %v544_v47 = vmul.f32 %v869_v43, %v534_v38 }
 0x15b   : > { %v538_v48 = vsel %vm537_vm2, %v525_v37, %v536_v44 }
 0x15c   : > { %v546_v50 = vsel %vm545_vm4, %v534_v38, %v544_v47  ;;  %v541_v51 = vsel %vm539_vm3, %v540_v45, %v538_v48 }
 0x15d   : > { %v542_v52 = vmax.f32 %v541_v51, 1e-08  ;;  %v549_v53 = vsel %vm547_vm5, %v548_v49, %v546_v50 }
 0x15e   : > { %v550_v55 = vmax.f32 %v549_v53, 1e-08 }
 0x160   : > { %v551_v56 = vmul.f32 %v550_v55, %v542_v52 }
 0x162   : > { %870 = vrcp.f32 %v551_v56 }
 0x16f   : > { %v871_v61 = vpop.eup %870 }
 0x170   : > { %v553_v62 = vmul.f32 %v871_v61, %v516_v60 }
 0x172   : > { %554 = vst [vmem:[%s351_s27] sm:$0x1] %v553_v62 }
 0x173   : > { %997 = shalt.err (!%p994_p7)
}
 0x174   : > { %s998_s20 = scalar_lea.hbm %s567_s26, 16  ;;  %s1002_s17 = scalar_lea.hbm %s1329_s4, 32 }
 0x175   : > { %p999_p6 = scmp.ne.s32.totalorder %s567_s26, %s998_s20  ;;  %p1003_p2 = scmp.lt.s32.totalorder %s567_s26, %s1329_s4 }
 0x176   : > { %p1004_p8 = scmp.lt.s32.totalorder %s1002_s17, %s998_s20 }
 0x177   : > { %p1000_p10 = pnand %p999_p6, %p1163_p9 }
 0x178   : > { %p1005_p0 = por %p1004_p8, %p1003_p2 }
 0x179   : > { %p1001_p13 = pneg %p1000_p10 }
 0x17b   : > { %p1006_p12 = pnand %p1005_p0, %p1001_p13 }
 0x17d   : > { %1009 = shalt.err (!%p1006_p12)
}
 0x17e   : > { %785 = dma.vmem_to_hbm [thread:$0]  (%p1163_p9), %s570_s12, 16, %s567_s26, %s556_s1  }
 0x17f PF: > { %s1363_s2 = sld [smem:[#allocation16_spill]]  ;;  %s581_s6 = sand.u32 1, %s1052_s15  }
 0x180   : > { %s582_s13 = scalar_lea.sflag [#allocation4], %s581_s6 }
 0x185   : > { %p1364_p1 = scmp.ge.s32.totalorder %s1363_s2, 2 }
 0x187   : > { %p801_p3 = pnand %p1364_p1, %p1170_p11 }
 0x189   : > { %p802_p4 = pneg %p801_p3 }
 0x18b   : > { %1047 = dma.done.wait (%p802_p4), %s582_s13, 16  }
 0x18c   : > { %1049 = vsyncadd (%p802_p4), %s582_s13, 4294967280  ;;  %s26_s20 = sadd.s32 1, %s1363_s2   ;;  %s1365_s23 = sld [smem:[#allocation15_spill]] }
 0x18d   : > { %p23_p5 = scmp.ge.s32.totalorder %s26_s20, 4   ;;  %s1366_s17 = sld [smem:[#allocation18_spill]] }
 0x18e   : > { %s1367_s28 = sld [smem:[#allocation17_spill]]  ;;  %s1368_s15 = smov %s1056_s16 }
 0x18f   : > { %s1370_s18 = smov %s1068_s19 }
 0x190   :  { %25 = sbr.rel (!%p23_p5) target bundleno = 14 (0xe), region = 118 }
 0x192   : > { %s1369_s16 = smov %s1365_s23 }
 0x194   : > { %s1371_s19 = smov %s1367_s28 }
 0x195   :  { %586 = vsyncpa [#allocation3], 1 }
 0x196   :  { %588 = vsyncpa [#allocation3 + $0x1], 1 }
 0x197   :  { %589 = vsyncpa [#allocation6], 1 }
 0x198   :  { %591 = vsyncpa [#allocation6 + $0x1], 1 }
 0x199   :  { %592 = vsyncpa [#allocation9], 1 }
 0x19a   :  { %594 = vsyncpa [#allocation9 + $0x1], 1 }
 0x19b   :  { %595 = vsyncpa [#allocation4], 1 }
 0x19c   :  { %597 = vsyncpa [#allocation4 + $0x1], 1 }

</bundles_post_ra>
